<compile_context>
chip_gen: v7x
topology: tpu7x:2x2x1
jax: 0.10.0
libtpu: 0.0.40
codegen_flags: <defaults>
</compile_context>

<pallas_src>
import math

import jax
import jax.numpy as jnp
from jax import lax
from jax.experimental import pallas as pl
from jax.experimental.pallas import tpu as pltpu

_LANE = 128
_SUBLANE = 8
_MAX_TR = 512              # row-tile cap: keeps (TR,128) accumulators / chunk code small
_TARGET_CHUNK = 16 * 1024  # elements per inner compute chunk (per input)


def _round_up(x, m):
    return ((x + m - 1) // m) * m


def _round_down(x, m):
    return (x // m) * m


def _chip_config():
    """Per-TPU-generation block size / VMEM budget for this mem-bound kernel."""
    kind = ""
    try:
        kind = jax.devices()[0].device_kind.lower()
    except Exception:
        pass
    if "v7" in kind:
        # ~3.2 TB/s HBM, 64 MiB VMEM/TC, 2 TensorCores: big blocks + row split.
        # 2 inputs x 2 pipeline buffers x 8 MiB = 32 MiB < 48 MiB limit < 64 MiB phys.
        return dict(block_bytes=8 << 20, vmem_limit=48 << 20, split_rows=True)
    if "v6" in kind:
        # ~1.4 TB/s HBM, 128 MiB VMEM: 6 MiB blocks, generous limit.
        return dict(block_bytes=6 << 20, vmem_limit=56 << 20, split_rows=False)
    if "v5 lite" in kind or "v5e" in kind or "v5lite" in kind:
        # ~0.82 TB/s HBM: 3 MiB blocks already ~HBM roofline; modest limit.
        return dict(block_bytes=3 << 20, vmem_limit=32 << 20, split_rows=False)
    # Unknown generation: conservative but safe everywhere (>=64 MiB physical VMEM).
    return dict(block_bytes=4 << 20, vmem_limit=48 << 20, split_rows=False)


def _choose_tiles(R, T, itemsize, block_bytes, split_rows):
    """Pick (TR, TT, inner).

    TR    row tile, multiple of the dtype's sublane packing, capped at _MAX_TR.
    TT    time tile, multiple of `inner`, sized so TR*TT*itemsize ~= block_bytes.
    inner lanes per in-kernel compute chunk (multiple of 128).
    """
    sublane = max(_SUBLANE, 32 // itemsize)      # 8 for f32, 16 for bf16, 32 for int8
    r_aligned = _round_up(R, sublane)
    t_aligned = _round_up(T, _LANE)

    # Rows first (so few-rows / long-time workloads still get multi-MiB blocks).
    TR = min(r_aligned, _MAX_TR)
    if split_rows and r_aligned >= 2 * sublane:
        # Guarantee >=2 row blocks so both v7x TensorCores get work.
        TR = min(TR, _round_up((r_aligned + 1) // 2, sublane))

    # Inner compute chunk: ~_TARGET_CHUNK elements, lane-aligned, <= available time.
    inner = max(_LANE, _round_down(_TARGET_CHUNK // TR, _LANE))
    inner = min(inner, t_aligned)

    # Time tile: fill the per-block byte budget with a multiple of `inner`.
    budget_lanes = max(inner, _round_down(block_bytes // (TR * itemsize), inner))
    TT = min(budget_lanes, _round_up(t_aligned, inner))
    return TR, TT, inner


def _make_esr_kernel(TR, TT, inner, T, ragged_t):
    n_inner = TT // inner
    n_fold = inner // _LANE

    def kernel(x_ref, t_ref, out_ref, num_acc, den_acc):
        k = pl.program_id(1)

        @pl.when(k == 0)
        def _init():
            num_acc[...] = jnp.zeros_like(num_acc)
            den_acc[...] = jnp.zeros_like(den_acc)

        if ragged_t:
            # Hoisted, loop-invariant pieces of the valid-lane mask.
            lane_idx = lax.broadcasted_iota(jnp.int32, (TR, inner), 1)
            remaining0 = T - k * TT            # valid lanes left at start of this tile

        def chunk(j):
            start = j * inner
            if not isinstance(j, int):
                start = pl.multiple_of(start, inner)
            xs = x_ref[:, pl.ds(start, inner)].astype(jnp.float32)
            ts = t_ref[:, pl.ds(start, inner)].astype(jnp.float32)
            if ragged_t:
                valid = lane_idx < (remaining0 - j * inner)
                xs = jnp.where(valid, xs, 0.0)
                ts = jnp.where(valid, ts, 0.0)
            d = ts - xs
            nsq = d * d
            dsq = ts * ts
            # Fold `inner` lanes down to 128 with pure elementwise (VALU) adds --
            # no cross-lane (XLU) reduction in the hot loop.
            nf = nsq[:, :_LANE]
            df = dsq[:, :_LANE]
            for c in range(1, n_fold):
                sl = slice(c * _LANE, (c + 1) * _LANE)
                nf = nf + nsq[:, sl]
                df = df + dsq[:, sl]
            num_acc[...] += nf
            den_acc[...] += df

        if n_inner <= 4:
            for j in range(n_inner):           # short trip count: static unroll
                chunk(j)
        else:
            pl.loop(0, n_inner)(chunk)

        @pl.when(k == pl.num_programs(1) - 1)
        def _finalize():
            # One cross-lane reduction + divide per row block (not per step).
            num = jnp.sum(num_acc[...], axis=-1, keepdims=True)
            den = jnp.sum(den_acc[...], axis=-1, keepdims=True)
            out_ref[...] = num / den

    return kernel


def esr_loss(inp, target, reduction="mean"):
    """Error-to-signal ratio loss.  inp/target: (batch, nchs, ..., time)."""
    assert inp.shape == target.shape, (inp.shape, target.shape)
    lead_shape = inp.shape[:-1]
    T = inp.shape[-1]
    R = int(math.prod(lead_shape)) if lead_shape else 1

    x2 = inp.reshape(R, T)
    t2 = target.reshape(R, T)
    itemsize = jnp.dtype(x2.dtype).itemsize

    cfg = _chip_config()
    TR, TT, inner = _choose_tiles(R, T, itemsize, cfg["block_bytes"], cfg["split_rows"])
    ragged_t = (T % TT) != 0                    # partial last time block -> in-kernel mask
    grid = (pl.cdiv(R, TR), pl.cdiv(T, TT))

    cost = pl.CostEstimate(
        flops=5 * R * T,
        transcendentals=0,
        bytes_accessed=2 * R * T * itemsize + R * 4,
    )

    losses = pl.pallas_call(
        _make_esr_kernel(TR, TT, inner, T, ragged_t),
        out_shape=jax.ShapeDtypeStruct((R, 1), jnp.float32),
        grid_spec=pltpu.PrefetchScalarGridSpec(
            num_scalar_prefetch=0,
            grid=grid,
            in_specs=[
                pl.BlockSpec((TR, TT), lambda i, k: (i, k)),
                pl.BlockSpec((TR, TT), lambda i, k: (i, k)),
            ],
            out_specs=pl.BlockSpec((TR, 1), lambda i, k: (i, 0)),
            scratch_shapes=[
                pltpu.VMEM((TR, _LANE), jnp.float32),
                pltpu.VMEM((TR, _LANE), jnp.float32),
            ],
        ),
        compiler_params=pltpu.CompilerParams(
            dimension_semantics=("parallel", "arbitrary"),
            vmem_limit_bytes=cfg["vmem_limit"],
        ),
        cost_estimate=cost,
    )(x2, t2)

    losses = losses[:, 0].reshape(lead_shape)
    if reduction == "mean":
        return jnp.mean(losses)
    if reduction == "sum":
        return jnp.sum(losses)
    if reduction == "none":
        return losses
    raise ValueError(f"unknown reduction: {reduction}")


def _esr_ref(inp, target, reduction="mean"):
    # Parity with auraloss ESRLoss as given (no eps in the denominator).
    losses = jnp.sum(jnp.abs(target - inp) ** 2, axis=-1) / jnp.sum(
        jnp.abs(target) ** 2, axis=-1
    )
    if reduction == "mean":
        return jnp.mean(losses)
    if reduction == "sum":
        return jnp.sum(losses)
    return losses


if __name__ == "__main__":
    key = jax.random.PRNGKey(0)
    k1, k2, k3, k4 = jax.random.split(key, 4)

    # Case 1: aligned shapes (batch, nchs, time)
    B, C, T = 2, 4, 256
    inp = jax.random.normal(k1, (B, C, T), dtype=jnp.float32)
    target = jax.random.normal(k2, (B, C, T), dtype=jnp.float32)

    out_mean = jax.block_until_ready(esr_loss(inp, target, reduction="mean"))
    ref_mean = _esr_ref(inp, target, reduction="mean")
    assert jnp.allclose(out_mean, ref_mean, rtol=1e-5, atol=1e-6), (out_mean, ref_mean)

    out_none = jax.block_until_ready(esr_loss(inp, target, reduction="none"))
    ref_none = _esr_ref(inp, target, reduction="none")
    assert jnp.allclose(out_none, ref_none, rtol=1e-5, atol=1e-6)

    # Case 2: ragged shapes (rows=6 not multiple of 8, time=300 not multiple of 128)
    # exercises the no-pad / in-kernel-mask path.
    B2, C2, T2 = 2, 3, 300
    inp2 = jax.random.normal(k3, (B2, C2, T2), dtype=jnp.float32)
    target2 = jax.random.normal(k4, (B2, C2, T2), dtype=jnp.float32)

    out_sum = jax.block_until_ready(esr_loss(inp2, target2, reduction="sum"))
    ref_sum = _esr_ref(inp2, target2, reduction="sum")
    assert jnp.allclose(out_sum, ref_sum, rtol=1e-5, atol=1e-6), (out_sum, ref_sum)

    print("KERNEL_OK")
</pallas_src>

<mosaic_0001>
module attributes {stable_mosaic.version = 11 : i64} {
  func.func @kernel(%arg0: i32, %arg1: i32, %arg2: memref<8x256xf32, #tpu.memory_space<vmem>>, %arg3: memref<8x256xf32, #tpu.memory_space<vmem>>, %arg4: memref<8x1xf32, #tpu.memory_space<vmem>>, %arg5: memref<8x128xf32, #tpu.memory_space<vmem>>, %arg6: memref<8x128xf32, #tpu.memory_space<vmem>>) attributes {dimension_semantics = [#tpu.dimension_semantics<parallel>, #tpu.dimension_semantics<arbitrary>], iteration_bounds = array<i64: 1, 1>, scalar_prefetch = 0 : i64, scratch_operands = 2 : i64, tpu.core_type = #tpu.core_type<tc>, window_params = [{transform_indices = @transform_0, window_bounds = array<i64: 8, 256>}, {transform_indices = @transform_1, window_bounds = array<i64: 8, 256>}, {transform_indices = @transform_2, window_bounds = array<i64: 8, 1>}]} {
    %c0_i32 = arith.constant 0 : i32
    %0 = arith.cmpi eq, %arg1, %c0_i32 : i32
    %1 = arith.extui %0 : i1 to i32
    %c0_i32_0 = arith.constant 0 : i32
    %2 = arith.cmpi ne, %1, %c0_i32_0 : i32
    scf.if %2 {
      %cst = arith.constant 0.000000e+00 : f32
      %23 = vector.broadcast %cst : f32 to vector<8x128xf32>
      %c0_14 = arith.constant 0 : index
      %c0_15 = arith.constant 0 : index
      %24 = vector.load %arg5[%c0_14, %c0_15] : memref<8x128xf32, #tpu.memory_space<vmem>>, vector<8x128xf32>
      tpu.vector_store %arg5[%c0_14, %c0_15], %23 {strides = array<i32>} : memref<8x128xf32, #tpu.memory_space<vmem>>, vector<8x128xf32>,
      %cst_16 = arith.constant 0.000000e+00 : f32
      %25 = vector.broadcast %cst_16 : f32 to vector<8x128xf32>
      %c0_17 = arith.constant 0 : index
      %c0_18 = arith.constant 0 : index
      %26 = vector.load %arg6[%c0_17, %c0_18] : memref<8x128xf32, #tpu.memory_space<vmem>>, vector<8x128xf32>
      tpu.vector_store %arg6[%c0_17, %c0_18], %25 {strides = array<i32>} : memref<8x128xf32, #tpu.memory_space<vmem>>, vector<8x128xf32>,
    } else {
    }
    %c0 = arith.constant 0 : index
    %c0_1 = arith.constant 0 : index
    %3 = vector.load %arg2[%c0, %c0_1] : memref<8x256xf32, #tpu.memory_space<vmem>>, vector<8x256xf32>
    %c0_2 = arith.constant 0 : index
    %c0_3 = arith.constant 0 : index
    %4 = vector.load %arg3[%c0_2, %c0_3] : memref<8x256xf32, #tpu.memory_space<vmem>>, vector<8x256xf32>
    %5 = arith.subf %4, %3 : vector<8x256xf32>
    %6 = arith.mulf %5, %5 : vector<8x256xf32>
    %7 = arith.mulf %4, %4 : vector<8x256xf32>
    %8 = vector.extract_strided_slice %6 {offsets = [0, 0], sizes = [8, 128], strides = [1, 1]} : vector<8x256xf32> to vector<8x128xf32>
    %9 = vector.extract_strided_slice %7 {offsets = [0, 0], sizes = [8, 128], strides = [1, 1]} : vector<8x256xf32> to vector<8x128xf32>
    %10 = vector.extract_strided_slice %6 {offsets = [0, 128], sizes = [8, 128], strides = [1, 1]} : vector<8x256xf32> to vector<8x128xf32>
    %11 = arith.addf %8, %10 : vector<8x128xf32>
    %12 = vector.extract_strided_slice %7 {offsets = [0, 128], sizes = [8, 128], strides = [1, 1]} : vector<8x256xf32> to vector<8x128xf32>
    %13 = arith.addf %9, %12 : vector<8x128xf32>
    %c0_4 = arith.constant 0 : index
    %c0_5 = arith.constant 0 : index
    %14 = vector.load %arg5[%c0_4, %c0_5] : memref<8x128xf32, #tpu.memory_space<vmem>>, vector<8x128xf32>
    %15 = arith.addf %14, %11 : vector<8x128xf32>
    %c0_6 = arith.constant 0 : index
    %c0_7 = arith.constant 0 : index
    %16 = vector.load %arg5[%c0_6, %c0_7] : memref<8x128xf32, #tpu.memory_space<vmem>>, vector<8x128xf32>
    tpu.vector_store %arg5[%c0_6, %c0_7], %15 {strides = array<i32>} : memref<8x128xf32, #tpu.memory_space<vmem>>, vector<8x128xf32>,
    %c0_8 = arith.constant 0 : index
    %c0_9 = arith.constant 0 : index
    %17 = vector.load %arg6[%c0_8, %c0_9] : memref<8x128xf32, #tpu.memory_space<vmem>>, vector<8x128xf32>
    %18 = arith.addf %17, %13 : vector<8x128xf32>
    %c0_10 = arith.constant 0 : index
    %c0_11 = arith.constant 0 : index
    %19 = vector.load %arg6[%c0_10, %c0_11] : memref<8x128xf32, #tpu.memory_space<vmem>>, vector<8x128xf32>
    tpu.vector_store %arg6[%c0_10, %c0_11], %18 {strides = array<i32>} : memref<8x128xf32, #tpu.memory_space<vmem>>, vector<8x128xf32>,
    %c0_i32_12 = arith.constant 0 : i32
    %20 = arith.cmpi eq, %arg1, %c0_i32_12 : i32
    %21 = arith.extui %20 : i1 to i32
    %c0_i32_13 = arith.constant 0 : i32
    %22 = arith.cmpi ne, %21, %c0_i32_13 : i32
    scf.if %22 {
      %c0_14 = arith.constant 0 : index
      %c0_15 = arith.constant 0 : index
      %23 = vector.load %arg5[%c0_14, %c0_15] : memref<8x128xf32, #tpu.memory_space<vmem>>, vector<8x128xf32>
      %cst = arith.constant dense<0.000000e+00> : vector<8xf32>
      %24 = vector.multi_reduction <add>, %23, %cst [1] : vector<8x128xf32> to vector<8xf32>
      %25 = vector.shape_cast %24 : vector<8xf32> to vector<8x1xf32>
      %c0_16 = arith.constant 0 : index
      %c0_17 = arith.constant 0 : index
      %26 = vector.load %arg6[%c0_16, %c0_17] : memref<8x128xf32, #tpu.memory_space<vmem>>, vector<8x128xf32>
      %cst_18 = arith.constant dense<0.000000e+00> : vector<8xf32>
      %27 = vector.multi_reduction <add>, %26, %cst_18 [1] : vector<8x128xf32> to vector<8xf32>
      %28 = vector.shape_cast %27 : vector<8xf32> to vector<8x1xf32>
      %29 = arith.divf %25, %28 : vector<8x1xf32>
      %c0_19 = arith.constant 0 : index
      %c0_20 = arith.constant 0 : index
      %30 = vector.load %arg4[%c0_19, %c0_20] : memref<8x1xf32, #tpu.memory_space<vmem>>, vector<8x1xf32>
      tpu.vector_store %arg4[%c0_19, %c0_20], %29 {strides = array<i32>} : memref<8x1xf32, #tpu.memory_space<vmem>>, vector<8x1xf32>,
    } else {
    }
    return
  }
  func.func @transform_0(%arg0: i32, %arg1: i32) -> (i32, i32) {
    %c0_i32 = arith.constant 0 : i32
    return %arg0, %arg1 : i32, i32
  }
  func.func @transform_1(%arg0: i32, %arg1: i32) -> (i32, i32) {
    %c0_i32 = arith.constant 0 : i32
    return %arg0, %arg1 : i32, i32
  }
  func.func @transform_2(%arg0: i32, %arg1: i32) -> (i32, i32) {
    %c0_i32 = arith.constant 0 : i32
    %c0_i32_0 = arith.constant 0 : i32
    return %arg0, %c0_i32 : i32, i32
  }
}

</mosaic_0001>

<bundles_post_ra>
// kernel: tpu_custom_call.1
= control target key start
LH: loop header
LB: loop body
LE: loop exit
PB: predicated region body
PF: predicated region fallthrough
CT: control target
= control target key end

     0   :  { %7 = vsyncpa [#allocation5], 0  ;;  %s174_s0 = inlined_call_operand.hbm [shape: f32[8,256], index: 0, kind: input, shape index: {}]   ;;  %s175_s1 = inlined_call_operand.hbm [shape: f32[8,256], index: 1, kind: input, shape index: {}]   ;;  %s176_s2 = inlined_call_operand.vmem [shape: f32[8,1], index: 2, kind: output, shape index: {}]  }
   0x1   :  { %8 = vsyncpa [#allocation7], 0  ;;  %s130_s9 = smov [#allocation4]   ;;  %s131_s11 = smov [#allocation6]  }
   0x2   :  { %s15_s10 = sshll.u32 %s130_s9, 4  ;;  %s25_s12 = sshll.u32 %s131_s11, 4  ;;  %s16_s10 = int_to_ptr.vmem [resolvable:$true] %s15_s10  ;;  %s26_s12 = int_to_ptr.vmem [resolvable:$true] %s25_s12 }
   0x3   :  { %s82_s15 = scalar_lea.hbm %s174_s0, 256 }
   0x4   :  { %p83_p0 = scmp.ne.s32.totalorder %s174_s0, %s82_s15  ;;  %p86_p1 = scmp.lt.u32.totalorder %s82_s15, %s174_s0 }
   0x6   :  { %p88_p2 = pnand %p86_p1, %p83_p0 }
   0x8   :  { %91 = shalt.err (!%p88_p2)
}
   0x9   :  { %s92_s20 = scalar_lea.vmem %s16_s10, 256  ;;  %p97_p4 = scmp.lt.s32.totalorder %s16_s10, %s16_s10 }
   0xa   :  { %p93_p3 = scmp.ne.s32.totalorder %s16_s10, %s92_s20  ;;  %p98_p5 = scmp.lt.s32.totalorder %s92_s20, %s92_s20 }
   0xc   :  { %p99_p6 = por %p98_p5, %p97_p4 }
   0xe   :  { %p100_p7 = pnand %p99_p6, %p93_p3 }
  0x10   :  { %103 = shalt.err (!%p100_p7)
}
  0x11   :  { %18 = dma.hbm_to_vmem [thread:$0]  %s174_s0, 256, %s16_s10, [#allocation5]  }
  0x12   :  { %s104_s25 = scalar_lea.hbm %s175_s1, 256 }
  0x13   :  { %p105_p8 = scmp.ne.s32.totalorder %s175_s1, %s104_s25  ;;  %p108_p9 = scmp.lt.u32.totalorder %s104_s25, %s175_s1 }
  0x15   :  { %p110_p10 = pnand %p108_p9, %p105_p8 }
  0x17   :  { %113 = shalt.err (!%p110_p10)
}
  0x18   :  { %s114_s30 = scalar_lea.vmem %s26_s12, 256  ;;  %p119_p12 = scmp.lt.s32.totalorder %s26_s12, %s26_s12 }
  0x19   :  { %p115_p11 = scmp.ne.s32.totalorder %s26_s12, %s114_s30  ;;  %p120_p13 = scmp.lt.s32.totalorder %s114_s30, %s114_s30 }
  0x1b   :  { %p121_p0 = por %p120_p13, %p119_p12 }
  0x1d   :  { %p122_p1 = pnand %p121_p0, %p115_p11 }
  0x1f   :  { %125 = shalt.err (!%p122_p1)
}
  0x20   :  { %28 = dma.hbm_to_vmem [thread:$0]  %s175_s1, 256, %s26_s12, [#allocation7]  }
  0x21   :  { %126 = dma.done.wait [#allocation5], 256  }
  0x22   :  { %127 = vsyncadd [#allocation5], 4294967040 }
  0x23   :  { %128 = dma.done.wait [#allocation7], 256  }
  0x24   :  { %129 = vsyncadd [#allocation7], 4294967040  ;;  %v43_v0 = vld [vmem:[#allocation6] sm:$0xff]  ;;  %v44_v1 = vld [vmem:[#allocation6 + $0x8] sm:$0xff]  ;;  %vm70_vm0 = vcmask 7168  }
  0x25   :  { %v41_v2 = vld [vmem:[#allocation4] sm:$0xff]  ;;  %v49_v3 = vmul.f32 %v43_v0, %v43_v0  ;;  %v50_v4 = vmul.f32 %v44_v1, %v44_v1  ;;  %v42_v5 = vld [vmem:[#allocation4 + $0x8] sm:$0xff] }
  0x26   :  { %v45_v6 = vsub.f32 %v43_v0, %v41_v2  ;;  %v46_v7 = vsub.f32 %v44_v1, %v42_v5 }
  0x27   :  { %v52_v8 = vadd.f32 %v50_v4, %v49_v3 }
  0x28   :  { %v47_v9 = vmul.f32 %v45_v6, %v45_v6  ;;  %v48_v10 = vmul.f32 %v46_v7, %v46_v7 }
  0x29   :  { %66 = vadd.xlane.f32.xlu0 %v52_v8 }
  0x2a   :  { %v51_v11 = vadd.f32 %v48_v10, %v47_v9 }
  0x2d   :  { %63 = vadd.xlane.f32.xlu0 %v51_v11 }
  0xb6   :  { %v67_v12 = vpop.xlane.xlu0 %66 }
  0xb7   :  { %80 = vrcp.f32 %v67_v12 }
  0xba   :  { %v64_v13 = vpop.xlane.xlu0 %63 }
  0xc1   :  { %v81_v14 = vpop.eup %80 }
  0xc2   :  { %v69_v15 = vmul.f32 %v81_v14, %v64_v13 }
  0xc4   :  { %71 = vst.msk [vmem:[%s176_s2] sm:$0xff] %vm70_vm0, %v69_v15 }
  0xc5   :  { %76 = vsyncpa [#allocation5], 1 }
  0xc6   :  { %77 = vsyncpa [#allocation7], 1 }

</bundles_post_ra>
